<compile_context>
chip_gen: v7x
topology: tpu7x:2x2x1
jax: 0.10.0
libtpu: 0.0.40
codegen_flags: <defaults>
</compile_context>

<pallas_src>
import functools

import jax
import jax.numpy as jnp
from jax.experimental import pallas as pl
from jax.experimental.pallas import tpu as pltpu


def _round_up(x, m):
    return ((x + m - 1) // m) * m


def _vmem_capacity_bytes(default=64 * 1024 * 1024):
    """Hardware-aware VMEM capacity (v5e/v6e: 128 MiB, v7x: 64 MiB per core)."""
    try:
        info = pltpu.get_tpu_info()
        cap = getattr(info, "vmem_capacity_bytes", None)
        if cap:
            return int(cap)
    except Exception:
        pass
    return default


def _fused_conv_bn_lif_kernel(w_ref, xcol_ref, gamma_ref, beta_ref, vinit_ref,
                              out_ref, *, count, eps, inv_tau, v_threshold):
    """One grid step owns a block of output channels and the WHOLE batch along the
    lane axis (lane index = n*Ho*Wo + s):
      conv : single MXU contraction (Cb, Kp) @ (Kp, N*Ho*Wo), f32 accumulation
      BN   : per-channel (per-row) training statistics, centered variance
      LIF  : v = v_init + (yn - v_init)/tau, spike = (v >= v_threshold)
    Channel blocks are fully independent (BN stats are per channel), so the grid
    axis is 'parallel' (megacore-shardable on v7x)."""
    y = jnp.dot(w_ref[...], xcol_ref[...],
                preferred_element_type=jnp.float32)            # (Cb, L) f32
    # NOTE: default MXU matmul precision; spikes are validated against an f32
    # HIGHEST-precision reference with a small threshold-edge flip tolerance.
    mean = jnp.sum(y, axis=1, keepdims=True) * (1.0 / count)    # (Cb, 1)
    d = y - mean
    var = jnp.sum(d * d, axis=1, keepdims=True) * (1.0 / count)
    a = gamma_ref[...] * jax.lax.rsqrt(var + eps)               # (Cb, 1)
    # Fold the BN affine and the 1/tau LIF charge into one per-channel FMA:
    #   v = y*(a/tau) + (beta - mean*a)/tau + v_init*(1 - 1/tau)
    scale = a * inv_tau
    shift = (beta_ref[...] - mean * a) * inv_tau
    v = y * scale + shift + vinit_ref[...] * (1.0 - inv_tau)
    out_ref[...] = (v >= v_threshold).astype(out_ref.dtype)
    # TODO(synk): ATan surrogate backward and BatchNorm running-stat updates are
    # training-only bookkeeping, not part of this forward kernel.


def conv_layer_forward(x_nchw, v_init_nchw, weight_oihw, gamma, beta, *,
                       stride=1, padding=0, tau=2.0, v_threshold=1.0, eps=1e-5,
                       compute_dtype=jnp.float32, spike_dtype=jnp.bfloat16,
                       cout_block=None):
    """ConvLayer.forward(x, v_init): NCHW inputs, NCHW spike output (0/1)."""
    N, Cin, H, W = x_nchw.shape
    Cout, Cin_w, KH, KW = weight_oihw.shape
    assert Cin == Cin_w
    Ho = (H + 2 * padding - KH) // stride + 1
    Wo = (W + 2 * padding - KW) // stride + 1
    HoWo = Ho * Wo
    L = N * HoWo                                  # flattened (batch, spatial) lane axis
    K = KH * KW * Cin

    compute_dtype = jnp.dtype(compute_dtype)
    spike_dtype = jnp.dtype(spike_dtype)
    # Sublane packing: 16 rows per vreg for any 16-bit operand/output, else 8.
    sub = 16 if (compute_dtype.itemsize < 4 or spike_dtype.itemsize < 4) else 8
    Kp = _round_up(K, sub)                        # pad contraction rows (free, zeros)

    if cout_block is None:
        cout_block = min(_round_up(Cout, sub), 256)
    cout_block = _round_up(cout_block, sub)
    Cout_pad = _round_up(Cout, cout_block)
    num_co = Cout_pad // cout_block
    cb = cout_block

    # --- glue: zero-pad + im2col in XLA (handles stride>1 without in-kernel strided
    # sublane slices), batch concatenated along the lane axis. ----------------------
    xp = jnp.pad(x_nchw.astype(jnp.float32),
                 ((0, 0), (0, 0), (padding, padding), (padding, padding)))
    cols = []
    for kh in range(KH):
        for kw in range(KW):
            xs = xp[:, :, kh:kh + (Ho - 1) * stride + 1:stride,
                          kw:kw + (Wo - 1) * stride + 1:stride]     # (N, Cin, Ho, Wo)
            cols.append(xs.reshape(N, Cin, HoWo))
    xcol = jnp.concatenate(cols, axis=1)                   # (N, K, HoWo), rows=(kh,kw,ci)
    xcol = jnp.transpose(xcol, (1, 0, 2)).reshape(K, L)    # lane index = n*HoWo + s
    xcol = jnp.pad(xcol, ((0, Kp - K), (0, 0))).astype(compute_dtype)
    # TODO(synk): on v5e (lowest HBM BW) form the KH*KW taps in-kernel from the padded
    # image (pltpu.roll lane shifts) instead of materializing the KH*KW-x im2col.

    w2 = jnp.transpose(weight_oihw.astype(jnp.float32),
                       (0, 2, 3, 1)).reshape(Cout, K)      # same (kh,kw,ci) row order
    w2 = jnp.pad(w2, ((0, Cout_pad - Cout), (0, Kp - K))).astype(compute_dtype)

    gamma2 = jnp.pad(gamma.astype(jnp.float32).reshape(Cout, 1),
                     ((0, Cout_pad - Cout), (0, 0)), constant_values=1.0)
    beta2 = jnp.pad(beta.astype(jnp.float32).reshape(Cout, 1),
                    ((0, Cout_pad - Cout), (0, 0)))
    vinit = jnp.transpose(v_init_nchw.astype(jnp.float32).reshape(N, Cout, HoWo),
                          (1, 0, 2)).reshape(Cout, L)
    vinit = jnp.pad(vinit, ((0, Cout_pad - Cout), (0, 0)))

    # --- hardware-aware VMEM budgeting --------------------------------------------
    cd = compute_dtype.itemsize
    sd = spike_dtype.itemsize
    per_step_bytes = (2 * cb * Kp * cd        # weights (double-buffered)
                      + 2 * Kp * L * cd       # xcol (grid-invariant; budget 2x)
                      + 4 * cb * 4            # gamma + beta
                      + 2 * cb * L * 4        # v_init
                      + 2 * cb * L * sd       # spike output
                      + 4 * cb * L * 4)       # in-kernel f32 temporaries (y, d, v)
    vmem_cap = _vmem_capacity_bytes()
    vmem_budget = int(vmem_cap * 0.9)
    if per_step_bytes > vmem_budget:
        # TODO(synk): add a K-tile / lane-tile grid axis (partial conv accumulation +
        # shifted sum-of-squares for BN) for production layer sizes exceeding VMEM.
        raise NotImplementedError("fused conv+BN+LIF block exceeds the VMEM budget")
    vmem_limit = int(min(max(per_step_bytes + (4 << 20), 32 << 20), vmem_budget))

    count = float(L)
    flops = 2 * Cout_pad * Kp * L + 8 * Cout_pad * L
    bytes_accessed = (Kp * L * cd + Cout_pad * Kp * cd + 8 * Cout_pad
                      + Cout_pad * L * 4 + Cout_pad * L * sd)

    out = pl.pallas_call(
        functools.partial(_fused_conv_bn_lif_kernel, count=count, eps=eps,
                          inv_tau=1.0 / tau, v_threshold=v_threshold),
        out_shape=jax.ShapeDtypeStruct((Cout_pad, L), spike_dtype),
        grid_spec=pltpu.PrefetchScalarGridSpec(
            num_scalar_prefetch=0,
            grid=(num_co,),                                  # independent channel blocks
            in_specs=[
                pl.BlockSpec((cb, Kp), lambda c: (c, 0)),    # weights
                pl.BlockSpec((Kp, L), lambda c: (0, 0)),     # xcol (grid-invariant)
                pl.BlockSpec((cb, 1), lambda c: (c, 0)),     # gamma
                pl.BlockSpec((cb, 1), lambda c: (c, 0)),     # beta
                pl.BlockSpec((cb, L), lambda c: (c, 0)),     # v_init
            ],
            out_specs=pl.BlockSpec((cb, L), lambda c: (c, 0)),
        ),
        compiler_params=pltpu.CompilerParams(
            dimension_semantics=("parallel",),               # v7x megacore: split channels
            vmem_limit_bytes=vmem_limit),
        cost_estimate=pl.CostEstimate(flops=flops, transcendentals=Cout_pad,
                                      bytes_accessed=bytes_accessed),
    )(w2, xcol, gamma2, beta2, vinit)

    # (Cout, N*Ho*Wo) -> NCHW spikes (0/1 values, lossless in bf16).
    out = out[:Cout].reshape(Cout, N, Ho, Wo)
    return jnp.transpose(out, (1, 0, 2, 3))


def _reference(x, v_init, w, gamma, beta, stride, padding, tau, vth, eps):
    y = jax.lax.conv_general_dilated(
        x, w, window_strides=(stride, stride),
        padding=[(padding, padding), (padding, padding)],
        dimension_numbers=("NCHW", "OIHW", "NCHW"),
        precision=jax.lax.Precision.HIGHEST)
    mean = jnp.mean(y, axis=(0, 2, 3), keepdims=True)
    var = jnp.mean((y - mean) ** 2, axis=(0, 2, 3), keepdims=True)
    yn = (y - mean) * jax.lax.rsqrt(var + eps)
    yn = yn * gamma.reshape(1, -1, 1, 1) + beta.reshape(1, -1, 1, 1)
    v = v_init + (yn - v_init) / tau
    return (v >= vth).astype(jnp.float32)


def _run_case(key, *, N, Cin, H, W, Cout, KS, stride, padding,
              compute_dtype=jnp.float32, spike_dtype=jnp.bfloat16,
              cout_block=None, tol=1e-3):
    k1, k2, k3, k4, k5 = jax.random.split(key, 5)
    tau, v_threshold, eps = 2.0, 1.0, 1e-5

    x = jax.random.normal(k1, (N, Cin, H, W), jnp.float32)
    bound = 1.0 / float(Cin * KS * KS) ** 0.5         # PyTorch conv default init range
    weight = jax.random.uniform(k2, (Cout, Cin, KS, KS), jnp.float32, -bound, bound)
    gamma = 1.0 + 0.1 * jax.random.normal(k4, (Cout,), jnp.float32)
    beta = 0.1 * jax.random.normal(k5, (Cout,), jnp.float32)

    Ho = (H + 2 * padding - KS) // stride + 1
    Wo = (W + 2 * padding - KS) // stride + 1
    v_init = 0.5 * jax.random.normal(k3, (N, Cout, Ho, Wo), jnp.float32)

    out = conv_layer_forward(x, v_init, weight, gamma, beta,
                             stride=stride, padding=padding,
                             tau=tau, v_threshold=v_threshold, eps=eps,
                             compute_dtype=compute_dtype, spike_dtype=spike_dtype,
                             cout_block=cout_block)
    out = jax.block_until_ready(out)

    ref = _reference(x, v_init, weight, gamma, beta, stride, padding,
                     tau, v_threshold, eps)
    assert out.shape == (N, Cout, Ho, Wo)
    # Spikes are binary; allow a tiny fraction of threshold-edge flips.
    mismatch_frac = float(jnp.mean(jnp.abs(out.astype(jnp.float32) - ref)))
    assert mismatch_frac < tol, f"spike mismatch fraction {mismatch_frac}"


if __name__ == "__main__":
    key = jax.random.PRNGKey(0)
    kA, kB, kC = jax.random.split(key, 3)

    # static_conv_snn-style ConvLayer(in=2, out=32, k=5, stride=1, pad=2):
    # lane axis = N*Ho*Wo = 512, bf16 spike writeback, single channel block.
    _run_case(kA, N=2, Cin=2, H=16, W=16, Cout=32, KS=5, stride=1, padding=2)

    # down-layer style ConvLayer(in=4, out=16, k=5, stride=2, pad=2):
    # Ho*Wo=64 but lanes stay dense (N*Ho*Wo=128); exercises the blocked
    # 'parallel' channel axis (2 blocks of 8) with f32 spikes.
    _run_case(kB, N=2, Cin=4, H=16, W=16, Cout=16, KS=5, stride=2, padding=2,
              spike_dtype=jnp.float32, cout_block=8)

    # bfloat16 compute path (f32 MXU accumulation) for v6e/v7x bandwidth:
    # 2 channel blocks of 16; looser tolerance for threshold-edge spike flips.
    _run_case(kC, N=2, Cin=4, H=16, W=16, Cout=32, KS=3, stride=1, padding=1,
              compute_dtype=jnp.bfloat16, spike_dtype=jnp.bfloat16,
              cout_block=16, tol=1.5e-2)

    print("KERNEL_OK")
</pallas_src>

<mosaic_0001>
module attributes {stable_mosaic.version = 11 : i64} {
  func.func @_fused_conv_bn_lif_kernel(%arg0: i32, %arg1: memref<32x64xf32, #tpu.memory_space<vmem>>, %arg2: memref<64x512xf32, #tpu.memory_space<vmem>>, %arg3: memref<32x1xf32, #tpu.memory_space<vmem>>, %arg4: memref<32x1xf32, #tpu.memory_space<vmem>>, %arg5: memref<32x512xf32, #tpu.memory_space<vmem>>, %arg6: memref<32x512xbf16, #tpu.memory_space<vmem>>) attributes {dimension_semantics = [#tpu.dimension_semantics<parallel>], iteration_bounds = array<i64: 1>, scalar_prefetch = 0 : i64, scratch_operands = 0 : i64, tpu.core_type = #tpu.core_type<tc>, window_params = [{transform_indices = @transform_0, window_bounds = array<i64: 32, 64>}, {pipeline_mode = #tpu.pipeline_mode<synchronous>, transform_indices = @transform_1, window_bounds = array<i64: 64, 512>}, {transform_indices = @transform_2, window_bounds = array<i64: 32, 1>}, {transform_indices = @transform_3, window_bounds = array<i64: 32, 1>}, {transform_indices = @transform_4, window_bounds = array<i64: 32, 512>}, {transform_indices = @transform_5, window_bounds = array<i64: 32, 512>}]} {
    %c0 = arith.constant 0 : index
    %c0_0 = arith.constant 0 : index
    %0 = vector.load %arg1[%c0, %c0_0] : memref<32x64xf32, #tpu.memory_space<vmem>>, vector<32x64xf32>
    %c0_1 = arith.constant 0 : index
    %c0_2 = arith.constant 0 : index
    %1 = vector.load %arg2[%c0_1, %c0_2] : memref<64x512xf32, #tpu.memory_space<vmem>>, vector<64x512xf32>
    %cst = arith.constant dense<0.000000e+00> : vector<32x512xf32>
    %2 = tpu.matmul %0, %1, %cst {dimension_numbers = #tpu.dot_dimension_numbers<[1], [0], [0], [1], [0, 0, 1, 1], [], []>} : vector<32x64xf32>, vector<64x512xf32>, vector<32x512xf32> -> vector<32x512xf32>
    %cst_3 = arith.constant dense<0.000000e+00> : vector<32xf32>
    %3 = vector.multi_reduction <add>, %2, %cst_3 [1] : vector<32x512xf32> to vector<32xf32>
    %4 = vector.shape_cast %3 : vector<32xf32> to vector<32x1xf32>
    %cst_4 = arith.constant 0.001953125 : f32
    %5 = vector.broadcast %cst_4 : f32 to vector<32x1xf32>
    %6 = arith.mulf %4, %5 : vector<32x1xf32>
    %7 = vector.broadcast %6 : vector<32x1xf32> to vector<32x512xf32>
    %8 = arith.subf %2, %7 : vector<32x512xf32>
    %9 = arith.mulf %8, %8 : vector<32x512xf32>
    %cst_5 = arith.constant dense<0.000000e+00> : vector<32xf32>
    %10 = vector.multi_reduction <add>, %9, %cst_5 [1] : vector<32x512xf32> to vector<32xf32>
    %11 = vector.shape_cast %10 : vector<32xf32> to vector<32x1xf32>
    %cst_6 = arith.constant 0.001953125 : f32
    %12 = vector.broadcast %cst_6 : f32 to vector<32x1xf32>
    %13 = arith.mulf %11, %12 : vector<32x1xf32>
    %c0_7 = arith.constant 0 : index
    %c0_8 = arith.constant 0 : index
    %14 = vector.load %arg3[%c0_7, %c0_8] : memref<32x1xf32, #tpu.memory_space<vmem>>, vector<32x1xf32>
    %cst_9 = arith.constant 9.99999974E-6 : f32
    %15 = vector.broadcast %cst_9 : f32 to vector<32x1xf32>
    %16 = arith.addf %13, %15 : vector<32x1xf32>
    %17 = math.rsqrt %16 : vector<32x1xf32>
    %18 = arith.mulf %14, %17 : vector<32x1xf32>
    %cst_10 = arith.constant 5.000000e-01 : f32
    %19 = vector.broadcast %cst_10 : f32 to vector<32x1xf32>
    %20 = arith.mulf %18, %19 : vector<32x1xf32>
    %c0_11 = arith.constant 0 : index
    %c0_12 = arith.constant 0 : index
    %21 = vector.load %arg4[%c0_11, %c0_12] : memref<32x1xf32, #tpu.memory_space<vmem>>, vector<32x1xf32>
    %22 = arith.mulf %6, %18 : vector<32x1xf32>
    %23 = arith.subf %21, %22 : vector<32x1xf32>
    %cst_13 = arith.constant 5.000000e-01 : f32
    %24 = vector.broadcast %cst_13 : f32 to vector<32x1xf32>
    %25 = arith.mulf %23, %24 : vector<32x1xf32>
    %26 = vector.broadcast %20 : vector<32x1xf32> to vector<32x512xf32>
    %27 = arith.mulf %2, %26 : vector<32x512xf32>
    %28 = vector.broadcast %25 : vector<32x1xf32> to vector<32x512xf32>
    %29 = arith.addf %27, %28 : vector<32x512xf32>
    %c0_14 = arith.constant 0 : index
    %c0_15 = arith.constant 0 : index
    %30 = vector.load %arg5[%c0_14, %c0_15] : memref<32x512xf32, #tpu.memory_space<vmem>>, vector<32x512xf32>
    %cst_16 = arith.constant 5.000000e-01 : f32
    %31 = vector.broadcast %cst_16 : f32 to vector<32x512xf32>
    %32 = arith.mulf %30, %31 : vector<32x512xf32>
    %33 = arith.addf %29, %32 : vector<32x512xf32>
    %cst_17 = arith.constant 1.000000e+00 : f32
    %34 = vector.broadcast %cst_17 : f32 to vector<32x512xf32>
    %35 = arith.cmpf oge, %33, %34 : vector<32x512xf32>
    %36 = arith.extui %35 : vector<32x512xi1> to vector<32x512xi32>
    %37 = arith.sitofp %36 : vector<32x512xi32> to vector<32x512xf32>
    %38 = arith.truncf %37 : vector<32x512xf32> to vector<32x512xbf16>
    %c0_18 = arith.constant 0 : index
    %c0_19 = arith.constant 0 : index
    %39 = vector.load %arg6[%c0_18, %c0_19] : memref<32x512xbf16, #tpu.memory_space<vmem>>, vector<32x512xbf16>
    tpu.vector_store %arg6[%c0_18, %c0_19], %38 {strides = array<i32>} : memref<32x512xbf16, #tpu.memory_space<vmem>>, vector<32x512xbf16>,
    return
  }
  func.func @transform_0(%arg0: i32) -> (i32, i32) {
    %c0_i32 = arith.constant 0 : i32
    %c0_i32_0 = arith.constant 0 : i32
    return %arg0, %c0_i32 : i32, i32
  }
  func.func @transform_1(%arg0: i32) -> (i32, i32) {
    %c0_i32 = arith.constant 0 : i32
    %c0_i32_0 = arith.constant 0 : i32
    %c0_i32_1 = arith.constant 0 : i32
    return %c0_i32, %c0_i32_0 : i32, i32
  }
  func.func @transform_2(%arg0: i32) -> (i32, i32) {
    %c0_i32 = arith.constant 0 : i32
    %c0_i32_0 = arith.constant 0 : i32
    return %arg0, %c0_i32 : i32, i32
  }
  func.func @transform_3(%arg0: i32) -> (i32, i32) {
    %c0_i32 = arith.constant 0 : i32
    %c0_i32_0 = arith.constant 0 : i32
    return %arg0, %c0_i32 : i32, i32
  }
  func.func @transform_4(%arg0: i32) -> (i32, i32) {
    %c0_i32 = arith.constant 0 : i32
    %c0_i32_0 = arith.constant 0 : i32
    return %arg0, %c0_i32 : i32, i32
  }
  func.func @transform_5(%arg0: i32) -> (i32, i32) {
    %c0_i32 = arith.constant 0 : i32
    %c0_i32_0 = arith.constant 0 : i32
    return %arg0, %c0_i32 : i32, i32
  }
}

</mosaic_0001>

<bundles_post_ra>
// kernel: tpu_custom_call.1
= control target key start
LH: loop header
LB: loop body
LE: loop exit
PB: predicated region body
PF: predicated region fallthrough
CT: control target
= control target key end

     0   :  { %10 = vsyncpa [#allocation3], 0  ;;  %s1048_s0 = inlined_call_operand.vmem [shape: f32[32,64], index: 0, kind: input, shape index: {}]   ;;  %s1049_s1 = inlined_call_operand.hbm [shape: f32[64,512], index: 1, kind: input, shape index: {}]   ;;  %s1050_s2 = inlined_call_operand.vmem [shape: f32[32,1], index: 2, kind: input, shape index: {}]   ;;  %s1051_s3 = inlined_call_operand.vmem [shape: f32[32,1], index: 3, kind: input, shape index: {}]   ;;  %s1052_s4 = inlined_call_operand.hbm [shape: f32[32,512], index: 4, kind: input, shape index: {}]   ;;  %s1053_s5 = inlined_call_operand.hbm [shape: bf16[32,512], index: 5, kind: output, shape index: {}]  }
   0x1   :  { %11 = vsyncpa [#allocation6], 0 }
   0x2   :  { %12 = vsyncpa [#allocation4], 0  ;;  %s797_s18 = smov [#allocation2]   ;;  %s725_s22 = scalar_lea.hbm %s1049_s1, 4096 }
   0x3   :  { %s20_s19 = sshll.u32 %s797_s18, 4  ;;  %p726_p0 = scmp.ne.s32.totalorder %s1049_s1, %s725_s22  ;;  %s21_s19 = int_to_ptr.vmem [resolvable:$true] %s20_s19 }
   0x4   :  { %p729_p1 = scmp.lt.u32.totalorder %s725_s22, %s1049_s1 }
   0x6   :  { %p731_p2 = pnand %p729_p1, %p726_p0 }
   0x8   :  { %734 = shalt.err (!%p731_p2)
}
   0x9   :  { %s735_s27 = scalar_lea.vmem %s21_s19, 4096  ;;  %p740_p4 = scmp.lt.s32.totalorder %s21_s19, %s21_s19 }
   0xa   :  { %p736_p3 = scmp.ne.s32.totalorder %s21_s19, %s735_s27  ;;  %p741_p5 = scmp.lt.s32.totalorder %s735_s27, %s735_s27 }
   0xc   :  { %p742_p6 = por %p741_p5, %p740_p4 }
   0xe   :  { %p743_p7 = pnand %p742_p6, %p736_p3 }
  0x10   :  { %746 = shalt.err (!%p743_p7)
}
  0x11   :  { %s798_s28 = smov 512   ;;  %s799_s29 = smov 32  }
  0x12   :  { %26 = dma.hbm_to_vmem [thread:$0]  %s1049_s1, 4096, %s21_s19, [#allocation3], %s798_s28, %s798_s28, %s799_s29  }
  0x13   :  { %s800_s7 = smov [#allocation5]   ;;  %s747_s11 = scalar_lea.hbm %s1052_s4, 2048 }
  0x14   :  { %s36_s8 = sshll.u32 %s800_s7, 4  ;;  %p748_p8 = scmp.ne.s32.totalorder %s1052_s4, %s747_s11  ;;  %s37_s8 = int_to_ptr.vmem [resolvable:$true] %s36_s8 }
  0x15   :  { %p751_p9 = scmp.lt.u32.totalorder %s747_s11, %s1052_s4 }
  0x17   :  { %p753_p10 = pnand %p751_p9, %p748_p8 }
  0x19   :  { %756 = shalt.err (!%p753_p10)
}
  0x1a   :  { %s757_s16 = scalar_lea.vmem %s37_s8, 2048  ;;  %p762_p12 = scmp.lt.s32.totalorder %s37_s8, %s37_s8 }
  0x1b   :  { %p758_p11 = scmp.ne.s32.totalorder %s37_s8, %s757_s16  ;;  %p763_p13 = scmp.lt.s32.totalorder %s757_s16, %s757_s16 }
  0x1d   :  { %p764_p0 = por %p763_p13, %p762_p12 }
  0x1f   :  { %p765_p1 = pnand %p764_p0, %p758_p11 }
  0x21   :  { %768 = shalt.err (!%p765_p1)
}
  0x22   :  { %42 = dma.hbm_to_vmem [thread:$0]  %s1052_s4, 2048, %s37_s8, [#allocation6], %s798_s28, %s798_s28, %s799_s29  }
  0x23   :  { %791 = dma.done.wait [#allocation3], 4096  }
  0x24   :  { %792 = vsyncadd [#allocation3], 4294963200 }
  0x25   :  { %793 = dma.done.wait [#allocation6], 2048  }
  0x26   :  { %794 = vsyncadd [#allocation6], 4294965248  ;;  %v801_v0 = vmov 0.0   ;;  %v54_v1 = vld [vmem:[#allocation2 + $0x8] sm:$0xff]  ;;  %v53_v3 = vld [vmem:[#allocation2] sm:$0xff]  ;;  %vm85_vm0 = vcmask 523264  }
  0x27   :  { %162 = vmatprep.mubr.f32.mxu0 %v801_v0  ;;  %251 = vmatprep.mubr.f32.mxu1 %v801_v0  ;;  %v58_v2 = vld [vmem:[#allocation2 + $0x28] sm:$0xff]  ;;  %v57_v5 = vld [vmem:[#allocation2 + $0x20] sm:$0xff]  ;;  %v56_v6 = vld [vmem:[#allocation2 + $0x18] sm:$0xff] }
  0x28   :  { %v674_v4 = vpack.c.bf16 %v58_v2, %v54_v1  ;;  %v60_v7 = vld [vmem:[#allocation2 + $0x38] sm:$0xff]  ;;  %v676_v8 = vpack.c.bf16 %v57_v5, %v53_v3  ;;  %v55_v10 = vld [vmem:[#allocation2 + $0x10] sm:$0xff]  ;;  %v62_v12 = vld [vmem:[#allocation2 + $0x48] sm:$0xff] }
  0x29   :  { %v690_v9 = vpack.c.bf16 %v60_v7, %v56_v6  ;;  %v59_v11 = vld [vmem:[#allocation2 + $0x30] sm:$0xff]  ;;  %v66_v14 = vld [vmem:[#allocation2 + $0x68] sm:$0xff]  ;;  %v61_v15 = vld [vmem:[#allocation2 + $0x40] sm:$0xff] }
  0x2a   :  { %675 = vmatprep.subr.bf16.mxu0 %v674_v4  ;;  %v692_v13 = vpack.c.bf16 %v59_v11, %v55_v10  ;;  %v65_v16 = vld [vmem:[#allocation2 + $0x60] sm:$0xff]  ;;  %v678_v17 = vpack.c.bf16 %v66_v14, %v62_v12  ;;  %v64_v19 = vld [vmem:[#allocation2 + $0x58] sm:$0xff]  ;;  %v63_v21 = vld [vmem:[#allocation2 + $0x50] sm:$0xff] }
  0x2b   :  { %677 = vmatpush1.bf16.msra.mxu0 %v676_v8  ;;  %691 = vmatprep.subr.bf16.mxu1 %v690_v9  ;;  %v680_v18 = vpack.c.bf16 %v65_v16, %v61_v15  ;;  %v68_v20 = vld [vmem:[#allocation2 + $0x78] sm:$0xff]  ;;  %v67_v23 = vld [vmem:[#allocation2 + $0x70] sm:$0xff]  ;;  %v70_v24 = vld [vmem:[#allocation2 + $0x88] sm:$0xff] }
  0x2c   :  { %693 = vmatpush1.bf16.msra.mxu1 %v692_v13  ;;  %v694_v22 = vpack.c.bf16 %v68_v20, %v64_v19  ;;  %v74_v25 = vld [vmem:[#allocation2 + $0xa8] sm:$0xff]  ;;  %679 = vmatprep.subr.bf16.mxu0 %v678_v17  ;;  %v696_v26 = vpack.c.bf16 %v67_v23, %v63_v21  ;;  %v69_v28 = vld [vmem:[#allocation2 + $0x80] sm:$0xff]  ;;  %v72_v30 = vld [vmem:[#allocation2 + $0x98] sm:$0xff] }
  0x2d   :  { %v682_v27 = vpack.c.bf16 %v74_v25, %v70_v24  ;;  %v73_v29 = vld [vmem:[#allocation2 + $0xa0] sm:$0xff]  ;;  %v76_v31 = vld [vmem:[#allocation2 + $0xb8] sm:$0xff]  ;;  %v71_v32 = vld [vmem:[#allocation2 + $0x90] sm:$0xff] }
  0x2e   :  { %695 = vmatprep.subr.bf16.mxu1 %v694_v22  ;;  %v75_v33 = vld [vmem:[#allocation2 + $0xb0] sm:$0xff]  ;;  %v684_v34 = vpack.c.bf16 %v73_v29, %v69_v28  ;;  %v698_v35 = vpack.c.bf16 %v76_v31, %v72_v30  ;;  %v78_v36 = vld [vmem:[#allocation2 + $0xc8] sm:$0xff]  ;;  %v77_v38 = vld [vmem:[#allocation2 + $0xc0] sm:$0xff] }
  0x2f   :  { %681 = vmatpush1.bf16.msra.mxu0 %v680_v18  ;;  %v82_v37 = vld [vmem:[#allocation2 + $0xe8] sm:$0xff]  ;;  %v700_v39 = vpack.c.bf16 %v75_v33, %v71_v32  ;;  %v81_v41 = vld [vmem:[#allocation2 + $0xe0] sm:$0xff]  ;;  %v80_v42 = vld [vmem:[#allocation2 + $0xd8] sm:$0xff] }
  0x30   :  { %697 = vmatpush1.bf16.msra.mxu1 %v696_v26  ;;  %683 = vmatprep.subr.bf16.mxu0 %v682_v27  ;;  %v686_v40 = vpack.c.bf16 %v82_v37, %v78_v36  ;;  %v84_v43 = vld [vmem:[#allocation2 + $0xf8] sm:$0xff]  ;;  %v79_v45 = vld [vmem:[#allocation2 + $0xd0] sm:$0xff]  ;;  %v688_v47 = vpack.c.bf16 %v81_v41, %v77_v38  ;;  %v49_v49 = vld [vmem:[%s1048_s0] sm:$0xff] }
  0x31   :  { %699 = vmatprep.subr.bf16.mxu1 %v698_v35  ;;  %v702_v44 = vpack.c.bf16 %v84_v43, %v80_v42  ;;  %v83_v46 = vld [vmem:[#allocation2 + $0xf0] sm:$0xff]  ;;  %v50_v50 = vld [vmem:[%s1048_s0 + $0x8] sm:$0xff]  ;;  %v52_v52 = vld [vmem:[%s1048_s0 + $0x18] sm:$0xff] }
  0x32   :  { %v704_v48 = vpack.c.bf16 %v83_v46, %v79_v45  ;;  %v51_v51 = vld [vmem:[%s1048_s0 + $0x10] sm:$0xff] }
  0x33   :  { %685 = vmatpush1.bf16.msra.mxu0 %v684_v34 }
  0x34   :  { %701 = vmatpush1.bf16.msra.mxu1 %v700_v39  ;;  %687 = vmatprep.subr.bf16.mxu0 %v686_v40 }
  0x35   :  { %703 = vmatprep.subr.bf16.mxu1 %v702_v44 }
  0x37   :  { %689 = vmatpush1.bf16.msra.mxu0 %v688_v47 }
  0x38   :  { %705 = vmatpush1.bf16.msra.mxu1 %v704_v48 }
  0x3a   :  { %634 = vmatmul.mubr.msk.f32.vlgmr.msra.gmra.mrb[0].mxu0 %vm85_vm0, %v49_v49 }
  0x3b   :  { %638 = vmatmul.mubr.msk.f32.vlgmr.msra.gmra.mrb[0].mxu1 %vm85_vm0, %v49_v49  ;;  %168 = vmatprep.mubr.f32.mxu0 %v801_v0 }
  0x3c   :  { %257 = vmatprep.mubr.f32.mxu1 %v801_v0 }
  0x3e   :  { %635 = vmatmul.mubr.msk.f32.gmra.mrb[2].mxu0 %vm85_vm0, %v50_v50 }
  0x3f   :  { %639 = vmatmul.mubr.msk.f32.gmra.mrb[2].mxu1 %vm85_vm0, %v50_v50  ;;  %174 = vmatprep.mubr.f32.mxu0 %v801_v0 }
  0x40   :  { %263 = vmatprep.mubr.f32.mxu1 %v801_v0 }
  0x42   :  { %636 = vmatmul.mubr.msk.f32.gmra.mrb[4].mxu0 %vm85_vm0, %v51_v51 }
  0x43   :  { %180 = vmatprep.mubr.f32.mxu0 %v801_v0  ;;  %640 = vmatmul.mubr.msk.f32.gmra.mrb[4].mxu1 %vm85_vm0, %v51_v51 }
  0x44   :  { %269 = vmatprep.mubr.f32.mxu1 %v801_v0 }
  0x46   :  { %637 = vmatmul.mubr.msk.f32.gmra.mrb[6].mxu0 %vm85_vm0, %v52_v52 }
  0x47   :  { %641 = vmatmul.mubr.msk.f32.gmra.mrb[6].mxu1 %vm85_vm0, %v52_v52 }
 0x10d   :  { %v888_v53 = vpop.f32.mrb[0].mxu0 }
 0x10e   :  { %v890_v54 = vpop.f32.mrb[1].mxu0  ;;  %v892_v55 = vpop.f32.mrb[0].mxu1 }
 0x10f   :  { %v276_v56 = vadd.f32 %v890_v54, %v888_v53  ;;  %v896_v57 = vpop.f32.mrb[1].mxu1 }
 0x111   :  { %v898_v58 = vpop.f32.mrb[2].mxu0  ;;  %v277_v59 = vadd.f32 %v276_v56, %v892_v55 }
 0x112   :  { %v901_v60 = vpop.f32.mrb[3].mxu0  ;;  %v903_v61 = vpop.f32.mrb[2].mxu1 }
 0x113   :  { %v281_v62 = vadd.f32 %v901_v60, %v898_v58  ;;  %v907_v63 = vpop.f32.mrb[3].mxu1  ;;  %v278_v1 = vadd.f32 %v277_v59, %v896_v57 }
 0x115   :  { %279 = vadd.xlane.f32.xlu0 %v278_v1  ;;  %v910_v2 = vpop.f32.mrb[4].mxu0  ;;  %v282_v3 = vadd.f32 %v281_v62, %v903_v61 }
 0x116   :  { %v913_v4 = vpop.f32.mrb[5].mxu0  ;;  %v915_v5 = vpop.f32.mrb[4].mxu1 }
 0x117   :  { %v286_v6 = vadd.f32 %v913_v4, %v910_v2  ;;  %v283_v7 = vadd.f32 %v282_v3, %v907_v63  ;;  %v920_v8 = vpop.f32.mrb[5].mxu1 }
 0x119   :  { %284 = vadd.xlane.f32.xlu0 %v283_v7  ;;  %v922_v9 = vpop.f32.mrb[6].mxu0  ;;  %v287_v10 = vadd.f32 %v286_v6, %v915_v5 }
 0x11a   :  { %v925_v11 = vpop.f32.mrb[7].mxu0  ;;  %v927_v12 = vpop.f32.mrb[6].mxu1 }
 0x11b   :  { %v291_v13 = vadd.f32 %v925_v11, %v922_v9  ;;  %v288_v14 = vadd.f32 %v287_v10, %v920_v8  ;;  %v932_v15 = vpop.f32.mrb[7].mxu1 }
 0x11d   :  { %289 = vadd.xlane.f32.xlu1 %v288_v14  ;;  %v292_v16 = vadd.f32 %v291_v13, %v927_v12 }
 0x11f   :  { %v293_v17 = vadd.f32 %v292_v16, %v932_v15 }
 0x121   :  { %294 = vadd.xlane.f32.xlu1 %v293_v17 }
 0x1a2   :  { %v280_v18 = vpop.xlane.xlu0 %279 }
 0x1a3   :  { %v936_v19 = vmul.f32 0.001953125, %v280_v18 }
 0x1a5   :  { %v300_v20 = vsub.f32 %v888_v53, %v936_v19  ;;  %v301_v21 = vsub.f32 %v890_v54, %v936_v19  ;;  %v302_v22 = vsub.f32 %v892_v55, %v936_v19  ;;  %v303_v24 = vsub.f32 %v896_v57, %v936_v19 }
 0x1a6   :  { %v285_v23 = vpop.xlane.xlu0 %284 }
 0x1a7   :  { %v946_v25 = vmul.f32 0.001953125, %v285_v23  ;;  %v316_v26 = vmul.f32 %v300_v20, %v300_v20  ;;  %v317_v27 = vmul.f32 %v301_v21, %v301_v21  ;;  %v318_v28 = vmul.f32 %v302_v22, %v302_v22 }
 0x1a8   :  { %v319_v34 = vmul.f32 %v303_v24, %v303_v24  ;;  %v802_v24 = vmov 0  }
 0x1a9   :  { %v332_v29 = vadd.f32 %v317_v27, %v316_v26  ;;  %v304_v30 = vsub.f32 %v898_v58, %v946_v25  ;;  %v305_v31 = vsub.f32 %v901_v60, %v946_v25  ;;  %v306_v32 = vsub.f32 %v903_v61, %v946_v25  ;;  %715 = vset.pattern.permute.xlu0 %v802_v24 }
 0x1aa   :  { %v290_v33 = vpop.xlane.xlu1 %289  ;;  %v307_v35 = vsub.f32 %v907_v63, %v946_v25  ;;  %716 = vset.pattern.permute.xlu1 %v802_v24  ;;  %v465_v24 = vld [vmem:[#allocation5 + $0x8] sm:$0xff] }
 0x1ab   :  { %v956_v36 = vmul.f32 0.001953125, %v290_v33  ;;  %v333_v37 = vadd.f32 %v332_v29, %v318_v28  ;;  %v320_v38 = vmul.f32 %v304_v30, %v304_v30  ;;  %v321_v39 = vmul.f32 %v305_v31, %v305_v31 }
 0x1ac   :  { %v322_v40 = vmul.f32 %v306_v32, %v306_v32  ;;  %v323_v46 = vmul.f32 %v307_v35, %v307_v35 }
 0x1ad   :  { %v334_v41 = vadd.f32 %v333_v37, %v319_v34  ;;  %v337_v42 = vadd.f32 %v321_v39, %v320_v38  ;;  %v308_v43 = vsub.f32 %v910_v2, %v956_v36  ;;  %v309_v44 = vsub.f32 %v913_v4, %v956_v36  ;;  %v356_v38 = vld [vmem:[%s1050_s2] sm:$0xff] }
 0x1ae   :  { %v295_v45 = vpop.xlane.xlu1 %294  ;;  %v310_v47 = vsub.f32 %v915_v5, %v956_v36  ;;  %v311_v48 = vsub.f32 %v920_v8, %v956_v36 }
 0x1af   :  { %v966_v49 = vmul.f32 0.001953125, %v295_v45  ;;  %335 = vadd.xlane.f32.xlu0 %v334_v41  ;;  %v338_v50 = vadd.f32 %v337_v42, %v322_v40  ;;  %v324_v51 = vmul.f32 %v308_v43, %v308_v43  ;;  %v325_v52 = vmul.f32 %v309_v44, %v309_v44  ;;  %v357_v42 = vld [vmem:[%s1050_s2 + $0x8] sm:$0xff] }
 0x1b0   :  { %v326_v56 = vmul.f32 %v310_v47, %v310_v47  ;;  %v327_v6 = vmul.f32 %v311_v48, %v311_v48 }
 0x1b1   :  { %v339_v59 = vadd.f32 %v338_v50, %v323_v46  ;;  %v342_v62 = vadd.f32 %v325_v52, %v324_v51  ;;  %v312_v1 = vsub.f32 %v922_v9, %v966_v49  ;;  %v313_v3 = vsub.f32 %v925_v11, %v966_v49  ;;  %v376_v46 = vld [vmem:[%s1051_s3] sm:$0xff]  ;;  %v358_v52 = vld [vmem:[%s1050_s2 + $0x10] sm:$0xff] }
 0x1b2   :  { %v314_v7 = vsub.f32 %v927_v12, %v966_v49  ;;  %v315_v13 = vsub.f32 %v932_v15, %v966_v49 }
 0x1b3   :  { %340 = vadd.xlane.f32.xlu1 %v339_v59  ;;  %v343_v10 = vadd.f32 %v342_v62, %v326_v56  ;;  %v328_v14 = vmul.f32 %v312_v1, %v312_v1  ;;  %v329_v16 = vmul.f32 %v313_v3, %v313_v3  ;;  %v377_v62 = vld [vmem:[%s1051_s3 + $0x8] sm:$0xff] }
 0x1b4   :  { %v330_v18 = vmul.f32 %v314_v7, %v314_v7  ;;  %v331_v21 = vmul.f32 %v315_v13, %v315_v13  ;;  %v359_v7 = vld [vmem:[%s1050_s2 + $0x18] sm:$0xff]  ;;  %s803_s2 = smov [#allocation7]  }
 0x1b5   :  { %v344_v17 = vadd.f32 %v343_v10, %v327_v6  ;;  %v347_v20 = vadd.f32 %v329_v16, %v328_v14 }
 0x1b7   :  { %345 = vadd.xlane.f32.xlu0 %v344_v17  ;;  %v348_v22 = vadd.f32 %v347_v20, %v330_v18  ;;  %v379_v20 = vld [vmem:[%s1051_s3 + $0x18] sm:$0xff] }
 0x1b9   :  { %v349_v23 = vadd.f32 %v348_v22, %v331_v21 }
 0x1bb   :  { %350 = vadd.xlane.f32.xlu1 %v349_v23 }
 0x23c   :  { %v336_v26 = vpop.xlane.xlu0 %335 }
 0x23d   :  { %v352_v27 = vmul.f32 0.001953125, %v336_v26  ;;  %v466_v26 = vld [vmem:[#allocation5 + $0x10] sm:$0xff] }
 0x23f   :  { %v360_v28 = vadd.f32 1e-05, %v352_v27  ;;  %v467_v27 = vld [vmem:[#allocation5 + $0x18] sm:$0xff] }
 0x240   :  { %v341_v29 = vpop.xlane.xlu1 %340 }
 0x241   :  { %717 = vrsqrt.f32 %v360_v28  ;;  %v353_v30 = vmul.f32 0.001953125, %v341_v29 }
 0x243   :  { %v361_v31 = vadd.f32 1e-05, %v353_v30 }
 0x244   :  { %v346_v32 = vpop.xlane.xlu0 %345 }
 0x245   :  { %719 = vrsqrt.f32 %v361_v31  ;;  %v354_v33 = vmul.f32 0.001953125, %v346_v32  ;;  %v481_v31 = vmul.f32 0.5, %v465_v24  ;;  %v482_v32 = vmul.f32 0.5, %v466_v26 }
 0x247   :  { %v362_v34 = vadd.f32 1e-05, %v354_v33 }
 0x248   :  { %v351_v35 = vpop.xlane.xlu1 %350 }
 0x249   :  { %721 = vrsqrt.f32 %v362_v34  ;;  %v355_v37 = vmul.f32 0.001953125, %v351_v35 }
 0x24b   :  { %v718_v39 = vpop.eup %717  ;;  %v363_v41 = vadd.f32 1e-05, %v355_v37 }
 0x24c   :  { %v368_v40 = vmul.f32 %v718_v39, %v356_v38  ;;  %v468_v38 = vld [vmem:[#allocation5 + $0x20] sm:$0xff]  ;;  %v469_v39 = vld [vmem:[#allocation5 + $0x28] sm:$0xff] }
 0x24d   :  { %723 = vrsqrt.f32 %v363_v41 }
 0x24e   :  { %v372_v43 = vmul.f32 0.5, %v368_v40  ;;  %v380_v44 = vmul.f32 %v368_v40, %v936_v19 }
 0x24f   :  { %v720_v45 = vpop.eup %719 }
 0x250   :  { %394 = vperm.xlu0 %715, %v372_v43   ;;  %v369_v47 = vmul.f32 %v720_v45, %v357_v42  ;;  %v384_v50 = vsub.f32 %v376_v46, %v380_v44  ;;  %v470_v45 = vld [vmem:[#allocation5 + $0x30] sm:$0xff]  ;;  %v471_v46 = vld [vmem:[#allocation5 + $0x38] sm:$0xff] }
 0x252   :  { %v373_v48 = vmul.f32 0.5, %v369_v47  ;;  %v388_v56 = vmul.f32 0.5, %v384_v50  ;;  %v381_v19 = vmul.f32 %v369_v47, %v946_v25  ;;  %v378_v25 = vld [vmem:[%s1051_s3 + $0x10] sm:$0xff]  ;;  %v484_v47 = vmul.f32 0.5, %v468_v38  ;;  %v477_v38 = vld [vmem:[#allocation5 + $0x68] sm:$0xff]  ;;  %s621_s3 = sshll.u32 %s803_s2, 4  ;;  %s622_s3 = int_to_ptr.vmem [resolvable:$true] %s621_s3 }
 0x253   :  { %v722_v51 = vpop.eup %721  ;;  %s769_s15 = scalar_lea.vmem %s622_s3, 1024  ;;  %p774_p3 = scmp.lt.s32.totalorder %s622_s3, %s622_s3 }
 0x254   :  { %399 = vperm.xlu1 %716, %v373_v48   ;;  %v370_v59 = vmul.f32 %v722_v51, %v358_v52  ;;  %v385_v3 = vsub.f32 %v377_v62, %v381_v19  ;;  %v485_v48 = vmul.f32 0.5, %v469_v39  ;;  %v478_v39 = vld [vmem:[#allocation5 + $0x70] sm:$0xff]  ;;  %p770_p2 = scmp.ne.s32.totalorder %s622_s3, %s769_s15  ;;  %p775_p4 = scmp.lt.s32.totalorder %s769_s15, %s769_s15 }
 0x256   :  { %v374_v1 = vmul.f32 0.5, %v370_v59  ;;  %v389_v10 = vmul.f32 0.5, %v385_v3  ;;  %v382_v14 = vmul.f32 %v370_v59, %v956_v36  ;;  %v464_v36 = vld [vmem:[#allocation5] sm:$0xff]  ;;  %v487_v59 = vmul.f32 0.5, %v471_v46  ;;  %p776_p5 = por %p775_p4, %p774_p3 }
 0x257   :  { %v724_v6 = vpop.eup %723  ;;  %v480_v30 = vmul.f32 0.5, %v464_v36 }
 0x258   :  { %430 = vperm.xlu1 %716, %v388_v56   ;;  %v371_v13 = vmul.f32 %v724_v6, %v359_v7  ;;  %v386_v17 = vsub.f32 %v378_v25, %v382_v14  ;;  %v486_v56 = vmul.f32 0.5, %v470_v45  ;;  %p777_p6 = pnand %p776_p5, %p770_p2 }
 0x25a   :  { %v375_v16 = vmul.f32 0.5, %v371_v13  ;;  %v383_v18 = vmul.f32 %v371_v13, %v966_v49  ;;  %v390_v21 = vmul.f32 0.5, %v386_v17  ;;  %v483_v49 = vmul.f32 0.5, %v467_v27  ;;  %v473_v13 = vld [vmem:[#allocation5 + $0x48] sm:$0xff] }
 0x25c   :  { %404 = vperm.xlu1 %716, %v374_v1   ;;  %v387_v22 = vsub.f32 %v379_v20, %v383_v18  ;;  %v474_v20 = vld [vmem:[#allocation5 + $0x50] sm:$0xff] }
 0x25e   :  { %v391_v23 = vmul.f32 0.5, %v387_v22 }
 0x260   :  { %435 = vperm.xlu1 %716, %v389_v10   ;;  %v472_v10 = vld [vmem:[#allocation5 + $0x40] sm:$0xff] }
 0x261   :  { %v488_v22 = vmul.f32 0.5, %v472_v10 }
 0x264   :  { %409 = vperm.xlu1 %716, %v375_v16  }
 0x268   :  { %440 = vperm.xlu1 %716, %v390_v21   ;;  %v475_v21 = vld [vmem:[#allocation5 + $0x58] sm:$0xff] }
 0x26c   :  { %445 = vperm.xlu1 %716, %v391_v23   ;;  %v489_v23 = vmul.f32 0.5, %v473_v13 }
 0x2cf   :  { %v395_v28 = vpop.permute.xlu0 %394 }
 0x2d0   :  { %v412_v33 = vmul.f32 %v395_v28, %v888_v53  ;;  %v413_v34 = vmul.f32 %v395_v28, %v890_v54  ;;  %v414_v35 = vmul.f32 %v395_v28, %v892_v55  ;;  %v415_v37 = vmul.f32 %v395_v28, %v896_v57 }
 0x2d3   :  { %v400_v29 = vpop.permute.xlu1 %399 }
 0x2d4   :  { %v416_v54 = vmul.f32 %v400_v29, %v898_v58  ;;  %v417_v55 = vmul.f32 %v400_v29, %v901_v60  ;;  %v418_v6 = vmul.f32 %v400_v29, %v903_v61  ;;  %v419_v58 = vmul.f32 %v400_v29, %v907_v63 }
 0x2d5   :  { %v490_v29 = vmul.f32 0.5, %v474_v20 }
 0x2d7   :  { %v431_v40 = vpop.permute.xlu1 %430 }
 0x2d8   :  { %v448_v41 = vadd.f32 %v431_v40, %v412_v33  ;;  %v449_v42 = vadd.f32 %v431_v40, %v413_v34  ;;  %v450_v43 = vadd.f32 %v431_v40, %v414_v35  ;;  %v451_v44 = vadd.f32 %v431_v40, %v415_v37  ;;  %v476_v34 = vld [vmem:[#allocation5 + $0x60] sm:$0xff]  ;;  %v479_v40 = vld [vmem:[#allocation5 + $0x78] sm:$0xff] }
 0x2d9   :  { %v492_v46 = vmul.f32 0.5, %v476_v34 }
 0x2da   :  { %v496_v50 = vadd.f32 %v480_v30, %v448_v41  ;;  %v497_v51 = vadd.f32 %v481_v31, %v449_v42  ;;  %v498_v53 = vadd.f32 %v482_v32, %v450_v43  ;;  %v499_v52 = vadd.f32 %v483_v49, %v451_v44 }
 0x2db   :  { %v405_v57 = vpop.permute.xlu1 %404  ;;  %v491_v30 = vmul.f32 0.5, %v475_v21 }
 0x2dc   :  { %vm512_vm1 = vcmp.ge.f32.partialorder %v496_v50, 1.0  ;;  %vm513_vm2 = vcmp.ge.f32.partialorder %v497_v51, 1.0  ;;  %vm514_vm3 = vcmp.ge.f32.partialorder %v498_v53, 1.0  ;;  %vm515_vm4 = vcmp.ge.f32.partialorder %v499_v52, 1.0 }
 0x2dd   :  { %v642_v19 = vsel %vm512_vm1, 1.0, %v801_v0  ;;  %v643_v62 = vsel %vm513_vm2, 1.0, %v801_v0  ;;  %v644_v1 = vsel %vm514_vm3, 1.0, %v801_v0  ;;  %v645_v3 = vsel %vm515_vm4, 1.0, %v801_v0 }
 0x2de   :  { %v666_v60 = vpack.c.bf16 %v643_v62, %v642_v19  ;;  %v667_v7 = vpack.c.bf16 %v645_v3, %v644_v1  ;;  %v420_v63 = vmul.f32 %v405_v57, %v910_v2  ;;  %v421_v27 = vmul.f32 %v405_v57, %v913_v4 }
 0x2df   :  { %v436_v14 = vpop.permute.xlu1 %435  ;;  %v422_v2 = vmul.f32 %v405_v57, %v915_v5  ;;  %v423_v4 = vmul.f32 %v405_v57, %v920_v8  ;;  %v495_v50 = vmul.f32 0.5, %v479_v40 }
 0x2e0   :  { %608 = vst [vmem:[#allocation7] sm:$0xff] %v666_v60  ;;  %609 = vst [vmem:[#allocation7 + $0x8] sm:$0xff] %v667_v7  ;;  %v452_v25 = vadd.f32 %v436_v14, %v416_v54  ;;  %v453_v16 = vadd.f32 %v436_v14, %v417_v55  ;;  %v454_v17 = vadd.f32 %v436_v14, %v418_v6 }
 0x2e1   :  { %v455_v18 = vadd.f32 %v436_v14, %v419_v58 }
 0x2e2   :  { %v500_v36 = vadd.f32 %v484_v47, %v452_v25  ;;  %v501_v24 = vadd.f32 %v485_v48, %v453_v16  ;;  %v502_v61 = vadd.f32 %v486_v56, %v454_v17  ;;  %v493_v47 = vmul.f32 0.5, %v477_v38 }
 0x2e3   :  { %v503_v26 = vadd.f32 %v487_v59, %v455_v18  ;;  %v410_v28 = vpop.permute.xlu1 %409  ;;  %v494_v48 = vmul.f32 0.5, %v478_v39 }
 0x2e4   :  { %vm516_vm5 = vcmp.ge.f32.partialorder %v500_v36, 1.0  ;;  %vm517_vm6 = vcmp.ge.f32.partialorder %v501_v24, 1.0  ;;  %vm518_vm7 = vcmp.ge.f32.partialorder %v502_v61, 1.0  ;;  %v424_v52 = vmul.f32 %v410_v28, %v922_v9 }
 0x2e5   :  { %vm519_vm8 = vcmp.ge.f32.partialorder %v503_v26, 1.0  ;;  %v646_v31 = vsel %vm516_vm5, 1.0, %v801_v0  ;;  %v647_v32 = vsel %vm517_vm6, 1.0, %v801_v0  ;;  %v648_v49 = vsel %vm518_vm7, 1.0, %v801_v0 }
 0x2e6   :  { %v649_v33 = vsel %vm519_vm8, 1.0, %v801_v0  ;;  %v668_v35 = vpack.c.bf16 %v647_v32, %v646_v31  ;;  %v425_v54 = vmul.f32 %v410_v28, %v925_v11  ;;  %v426_v55 = vmul.f32 %v410_v28, %v927_v12 }
 0x2e7   :  { %v669_v37 = vpack.c.bf16 %v649_v33, %v648_v49  ;;  %v441_v41 = vpop.permute.xlu1 %440  ;;  %v427_v57 = vmul.f32 %v410_v28, %v932_v15 }
 0x2e8   :  { %610 = vst [vmem:[#allocation7 + $0x10] sm:$0xff] %v668_v35  ;;  %v456_v42 = vadd.f32 %v441_v41, %v420_v63  ;;  %v457_v43 = vadd.f32 %v441_v41, %v421_v27  ;;  %v458_v44 = vadd.f32 %v441_v41, %v422_v2  ;;  %v459_v45 = vadd.f32 %v441_v41, %v423_v4 }
 0x2e9   :  { %611 = vst [vmem:[#allocation7 + $0x18] sm:$0xff] %v669_v37 }
 0x2ea   :  { %v504_v51 = vadd.f32 %v488_v22, %v456_v42  ;;  %v505_v5 = vadd.f32 %v489_v23, %v457_v43  ;;  %v506_v53 = vadd.f32 %v490_v29, %v458_v44  ;;  %v507_v8 = vadd.f32 %v491_v30, %v459_v45 }
 0x2eb   :  { %v446_v56 = vpop.permute.xlu1 %445 }
 0x2ec   :  { %vm520_vm9 = vcmp.ge.f32.partialorder %v504_v51, 1.0  ;;  %vm521_vm10 = vcmp.ge.f32.partialorder %v505_v5, 1.0  ;;  %vm522_vm11 = vcmp.ge.f32.partialorder %v506_v53, 1.0  ;;  %vm523_vm12 = vcmp.ge.f32.partialorder %v507_v8, 1.0 }
 0x2ed   :  { %v650_v59 = vsel %vm520_vm9, 1.0, %v801_v0  ;;  %v651_v19 = vsel %vm521_vm10, 1.0, %v801_v0  ;;  %v652_v62 = vsel %vm522_vm11, 1.0, %v801_v0  ;;  %v653_v1 = vsel %vm523_vm12, 1.0, %v801_v0 }
 0x2ee   :  { %v670_v9 = vpack.c.bf16 %v651_v19, %v650_v59  ;;  %v671_v3 = vpack.c.bf16 %v653_v1, %v652_v62  ;;  %v460_v11 = vadd.f32 %v446_v56, %v424_v52  ;;  %v461_v6 = vadd.f32 %v446_v56, %v425_v54 }
 0x2ef   :  { %v462_v12 = vadd.f32 %v446_v56, %v426_v55  ;;  %v463_v58 = vadd.f32 %v446_v56, %v427_v57 }
 0x2f0   :  { %612 = vst [vmem:[#allocation7 + $0x20] sm:$0xff] %v670_v9  ;;  %613 = vst [vmem:[#allocation7 + $0x28] sm:$0xff] %v671_v3  ;;  %v508_v15 = vadd.f32 %v492_v46, %v460_v11  ;;  %v509_v60 = vadd.f32 %v493_v47, %v461_v6 }
 0x2f1   :  { %v510_v7 = vadd.f32 %v494_v48, %v462_v12  ;;  %v511_v10 = vadd.f32 %v495_v50, %v463_v58 }
 0x2f2   :  { %vm524_vm13 = vcmp.ge.f32.partialorder %v508_v15, 1.0  ;;  %vm525_vm14 = vcmp.ge.f32.partialorder %v509_v60, 1.0 }
 0x2f3   :  { %vm526_vm15 = vcmp.ge.f32.partialorder %v510_v7, 1.0  ;;  %vm527_vm0 = vcmp.ge.f32.partialorder %v511_v10, 1.0  ;;  %v654_v13 = vsel %vm524_vm13, 1.0, %v801_v0  ;;  %v655_v14 = vsel %vm525_vm14, 1.0, %v801_v0 }
 0x2f4   :  { %v656_v25 = vsel %vm526_vm15, 1.0, %v801_v0  ;;  %v657_v16 = vsel %vm527_vm0, 1.0, %v801_v0  ;;  %v672_v17 = vpack.c.bf16 %v655_v14, %v654_v13 }
 0x2f5   :  { %v673_v18 = vpack.c.bf16 %v657_v16, %v656_v25 }
 0x2f6   :  { %614 = vst [vmem:[#allocation7 + $0x30] sm:$0xff] %v672_v17 }
 0x2f7   :  { %615 = vst [vmem:[#allocation7 + $0x38] sm:$0xff] %v673_v18 }
 0x2f8   :  { %780 = shalt.err (!%p777_p6)
}
 0x2f9   :  { %s781_s17 = scalar_lea.hbm %s1053_s5, 1024 }
 0x2fa   :  { %p782_p7 = scmp.ne.s32.totalorder %s1053_s5, %s781_s17  ;;  %p785_p8 = scmp.lt.u32.totalorder %s781_s17, %s1053_s5 }
 0x2fc   :  { %p787_p9 = pnand %p785_p8, %p782_p7 }
 0x2fe   :  { %790 = shalt.err (!%p787_p9)
}
 0x2ff   :  { %s804_s21 = smov 256   ;;  %s805_s22 = smov 16  }
 0x300   :  { %627 = dma.vmem_to_hbm [thread:$0]  %s622_s3, 1024, %s1053_s5, [#allocation4], %s804_s21, %s804_s21, %s805_s22  }
 0x301   :  { %795 = dma.done.wait [#allocation4], 1024  }
 0x302   :  { %796 = vsyncadd [#allocation4], 4294966272 }
 0x303   :  { %631 = vsyncpa [#allocation3], 1 }
 0x304   :  { %632 = vsyncpa [#allocation6], 1 }
 0x305   :  { %633 = vsyncpa [#allocation4], 1 }

</bundles_post_ra>
